<compile_context>
chip_gen: v5e
topology: v5e:2x2
jax: 0.10.0
libtpu: 0.0.40
codegen_flags: <defaults>
</compile_context>

<pallas_src>
import math

import jax
import jax.numpy as jnp
from jax.experimental import pallas as pl
from jax.experimental.pallas import tpu as pltpu


def _round_up(n, m):
    return ((n + m - 1) // m) * m


# ---------------------------------------------------------------------------
# Fused MLP kernel: one batch tile per grid step, every layer inside the body.
# refs = (x_ref, w0, b0, w1, b1, ..., wL, bL, out_ref)
#   w_i : (in_pad, out_pad) bf16   (resident in VMEM, constant index_map)
#   b_i : (1, out_pad)      f32
# ---------------------------------------------------------------------------
def _mlp_kernel(*refs):
    x_ref, out_ref = refs[0], refs[-1]
    wb = refs[1:-1]
    n_lin = len(wb) // 2

    h = x_ref[...].astype(jnp.float32)                 # (tb, in_pad), f32 chain
    for i in range(n_lin):
        w = wb[2 * i][...]                             # bf16 -> MXU, no up-cast
        b = wb[2 * i + 1][...]                         # f32 (1, out_pad)
        h = jnp.dot(h.astype(jnp.bfloat16), w,
                    preferred_element_type=jnp.float32) + b
        if i < n_lin - 1:
            h = jnp.maximum(h, 0.1 * h)                # LeakyReLU(0.1)
            # TODO(synk): nn.Dropout is training-only; inference forward is identity.
    out_ref[...] = h.astype(out_ref.dtype)


def _pick_batch_tile(batch, row_bytes, tile_budget_bytes):
    """Largest sublane-aligned batch tile that fits the double-buffered x/out
    tile budget and leaves >= 2 grid steps when the batch allows it (v7x)."""
    if batch <= 8:
        return 8
    for t in (1024, 512, 256, 128, 64, 32, 16, 8):
        if 2 * t * row_bytes > tile_budget_bytes:
            continue
        if t >= batch:            # keep >= 2 grid steps for megacore sharding
            continue
        return t
    return 8


# ---------------------------------------------------------------------------
# Wrapper: pads, builds specs, and calls pallas_call once for the whole model.
# ---------------------------------------------------------------------------
def forecasting_forward(x, model):
    batch, in_dim = x.shape
    assert in_dim == model.in_dim, (in_dim, model.in_dim)
    in_pad, out_pad = model.in_pad, model.out_pad

    # ---- tiling / batch padding -------------------------------------------
    row_bytes = 4 * (in_pad + out_pad)
    tile_budget = 24 * 2**20                      # leave room for weights (v7x 64 MiB)
    tb = _pick_batch_tile(batch, row_bytes, tile_budget)
    padded_batch = _round_up(batch, tb)
    grid = (padded_batch // tb,)

    x_pad = x
    if padded_batch != batch or in_pad != in_dim:
        x_pad = jnp.zeros((padded_batch, in_pad), x.dtype).at[:batch, :in_dim].set(x)

    # ---- VMEM budget --------------------------------------------------------
    param_bytes = sum(w.size * w.dtype.itemsize + b.size * b.dtype.itemsize
                      for w, b in model.params)
    tile_bytes = 2 * tb * in_pad * 4 + 2 * tb * out_pad * 4   # double-buffered x/out
    act_bytes = 4 * tb * max(in_pad, model.hid_pad, out_pad) * 4
    vmem_limit = int(min(100 * 2**20,
                         max(32 * 2**20,
                             2 * param_bytes + tile_bytes + act_bytes + 4 * 2**20)))

    # ---- cost estimate ------------------------------------------------------
    flops = 2 * padded_batch * sum(w.shape[0] * w.shape[1] for w, _ in model.params)
    bytes_accessed = (x_pad.size * x_pad.dtype.itemsize
                      + padded_batch * out_pad * 4 + param_bytes)
    cost = pl.CostEstimate(flops=flops, transcendentals=0,
                           bytes_accessed=bytes_accessed)

    flat_params = [t for wb in model.params for t in wb]

    def call(single_buffer_weights):
        def resident_spec(shape):
            nd = len(shape)
            kwargs = {}
            if single_buffer_weights:
                # Constant index_map -> no need to double-buffer the weights.
                kwargs["pipeline_mode"] = pl.Buffered(1)
            return pl.BlockSpec(shape, lambda i, _nd=nd: (0,) * _nd, **kwargs)

        in_specs = [pl.BlockSpec((tb, in_pad), lambda i: (i, 0))]
        for w, b in model.params:
            in_specs.append(resident_spec(w.shape))
            in_specs.append(resident_spec(b.shape))
        out_spec = pl.BlockSpec((tb, out_pad), lambda i: (i, 0))

        return pl.pallas_call(
            _mlp_kernel,
            out_shape=jax.ShapeDtypeStruct((padded_batch, out_pad), x.dtype),
            grid_spec=pltpu.PrefetchScalarGridSpec(
                num_scalar_prefetch=0,
                grid=grid,
                in_specs=in_specs,
                out_specs=out_spec,
            ),
            compiler_params=pltpu.CompilerParams(
                dimension_semantics=("parallel",),   # batch tiles are independent
                vmem_limit_bytes=vmem_limit,
            ),
            cost_estimate=cost,
        )(x_pad, *flat_params)

    try:
        out = call(True)       # single-buffered resident weights (VMEM diet, v7x)
    except Exception:
        out = call(False)      # fallback if Buffered(1)/pipeline_mode unsupported

    # PyTorch: self.layers[-1](x).view(x.shape[0], self.n_features)
    return out[:batch, :model.out_dim].reshape(batch, model.n_features)


# ---------------------------------------------------------------------------
# Forecasting_Model equivalent (forward-pass / inference semantics).
# ---------------------------------------------------------------------------
class ForecastingModelPallas:
    def __init__(self, n_features, in_dim, hid_dim, out_dim, n_layers, dropout, key):
        del dropout  # inference semantics: dropout is identity
        assert out_dim == n_features, (
            ".view(batch, n_features) requires out_dim == n_features")
        self.n_features = n_features
        self.in_dim, self.out_dim = in_dim, out_dim

        # Linear layers: in_dim->hid, (n_layers-1) x hid->hid, hid->out_dim
        dims = [in_dim] + [hid_dim] * n_layers + [out_dim]
        pdims = [_round_up(d, 128) for d in dims]     # lane-dense (128) padding
        self.in_pad, self.out_pad = pdims[0], pdims[-1]
        self.hid_pad = max(pdims)

        self.params = []
        for (fi, fo), (pfi, pfo) in zip(zip(dims[:-1], dims[1:]),
                                        zip(pdims[:-1], pdims[1:])):
            key, kw, kb = jax.random.split(key, 3)
            bound = 1.0 / math.sqrt(fi)               # PyTorch nn.Linear default init
            w = jax.random.uniform(kw, (fo, fi), jnp.float32, -bound, bound)
            b = jax.random.uniform(kb, (fo,), jnp.float32, -bound, bound)
            # Store transposed (in_pad, out_pad), zero-padded, bf16 for the MXU.
            w_t = jnp.zeros((pfi, pfo), jnp.float32).at[:fi, :fo].set(w.T)
            b_p = jnp.zeros((1, pfo), jnp.float32).at[0, :fo].set(b)
            self.params.append((w_t.astype(jnp.bfloat16), b_p))

    def __call__(self, x):
        return forecasting_forward(x, self)


# ---------------------------------------------------------------------------
# Pure-JAX reference (same math as the kernel: bf16 operands, f32 accumulate).
# ---------------------------------------------------------------------------
def forecasting_ref(x, model):
    batch, in_dim = x.shape
    h = jnp.zeros((batch, model.in_pad), jnp.float32).at[:, :in_dim].set(x)
    n_lin = len(model.params)
    for i, (w, b) in enumerate(model.params):
        h = jnp.dot(h.astype(jnp.bfloat16), w,
                    preferred_element_type=jnp.float32) + b
        if i < n_lin - 1:
            h = jnp.maximum(h, 0.1 * h)               # LeakyReLU(0.1); dropout = id
    return h[:, :model.out_dim].reshape(batch, model.n_features)


if __name__ == "__main__":
    batch, in_dim, hid_dim, n_layers = 2, 16, 32, 2
    n_features = 8
    out_dim = n_features   # .view(batch, n_features) requires out_dim == n_features

    key = jax.random.PRNGKey(0)
    key_p, key_x = jax.random.split(key)

    model = ForecastingModelPallas(n_features, in_dim, hid_dim, out_dim,
                                   n_layers, dropout=0.3, key=key_p)
    x = jax.random.normal(key_x, (batch, in_dim), jnp.float32)

    out = jax.block_until_ready(model(x))
    ref = forecasting_ref(x, model)

    assert out.shape == (batch, n_features), out.shape
    assert jnp.allclose(out, ref, atol=2e-3, rtol=2e-3), float(jnp.abs(out - ref).max())

    print("KERNEL_OK")
</pallas_src>

<mosaic_0001>
module attributes {stable_mosaic.version = 11 : i64} {
  func.func @_mlp_kernel(%arg0: i32, %arg1: memref<8x128xf32, #tpu.memory_space<vmem>>, %arg2: memref<128x128xbf16, #tpu.memory_space<vmem>>, %arg3: memref<1x128xf32, #tpu.memory_space<vmem>>, %arg4: memref<128x128xbf16, #tpu.memory_space<vmem>>, %arg5: memref<1x128xf32, #tpu.memory_space<vmem>>, %arg6: memref<128x128xbf16, #tpu.memory_space<vmem>>, %arg7: memref<1x128xf32, #tpu.memory_space<vmem>>, %arg8: memref<8x128xf32, #tpu.memory_space<vmem>>) attributes {dimension_semantics = [#tpu.dimension_semantics<parallel>], iteration_bounds = array<i64: 1>, scalar_prefetch = 0 : i64, scratch_operands = 0 : i64, tpu.core_type = #tpu.core_type<tc>, window_params = [{transform_indices = @transform_0, window_bounds = array<i64: 8, 128>}, {pipeline_mode = #tpu.pipeline_mode<synchronous>, transform_indices = @transform_1, window_bounds = array<i64: 128, 128>}, {pipeline_mode = #tpu.pipeline_mode<synchronous>, transform_indices = @transform_2, window_bounds = array<i64: 1, 128>}, {pipeline_mode = #tpu.pipeline_mode<synchronous>, transform_indices = @transform_3, window_bounds = array<i64: 128, 128>}, {pipeline_mode = #tpu.pipeline_mode<synchronous>, transform_indices = @transform_4, window_bounds = array<i64: 1, 128>}, {pipeline_mode = #tpu.pipeline_mode<synchronous>, transform_indices = @transform_5, window_bounds = array<i64: 128, 128>}, {pipeline_mode = #tpu.pipeline_mode<synchronous>, transform_indices = @transform_6, window_bounds = array<i64: 1, 128>}, {transform_indices = @transform_7, window_bounds = array<i64: 8, 128>}]} {
    %c0 = arith.constant 0 : index
    %c0_0 = arith.constant 0 : index
    %0 = vector.load %arg1[%c0, %c0_0] : memref<8x128xf32, #tpu.memory_space<vmem>>, vector<8x128xf32>
    %c0_1 = arith.constant 0 : index
    %c0_2 = arith.constant 0 : index
    %1 = vector.load %arg2[%c0_1, %c0_2] : memref<128x128xbf16, #tpu.memory_space<vmem>>, vector<128x128xbf16>
    %c0_3 = arith.constant 0 : index
    %c0_4 = arith.constant 0 : index
    %2 = vector.load %arg3[%c0_3, %c0_4] : memref<1x128xf32, #tpu.memory_space<vmem>>, vector<1x128xf32>
    %3 = arith.truncf %0 : vector<8x128xf32> to vector<8x128xbf16>
    %cst = arith.constant dense<0.000000e+00> : vector<8x128xf32>
    %4 = tpu.matmul %3, %1, %cst {dimension_numbers = #tpu.dot_dimension_numbers<[1], [0], [0], [1], [0, 0, 1, 1], [], []>} : vector<8x128xbf16>, vector<128x128xbf16>, vector<8x128xf32> -> vector<8x128xf32>
    %5 = vector.broadcast %2 : vector<1x128xf32> to vector<8x128xf32>
    %6 = arith.addf %4, %5 : vector<8x128xf32>
    %cst_5 = arith.constant 1.000000e-01 : f32
    %7 = vector.broadcast %cst_5 : f32 to vector<8x128xf32>
    %8 = arith.mulf %7, %6 : vector<8x128xf32>
    %9 = arith.maximumf %6, %8 : vector<8x128xf32>
    %c0_6 = arith.constant 0 : index
    %c0_7 = arith.constant 0 : index
    %10 = vector.load %arg4[%c0_6, %c0_7] : memref<128x128xbf16, #tpu.memory_space<vmem>>, vector<128x128xbf16>
    %c0_8 = arith.constant 0 : index
    %c0_9 = arith.constant 0 : index
    %11 = vector.load %arg5[%c0_8, %c0_9] : memref<1x128xf32, #tpu.memory_space<vmem>>, vector<1x128xf32>
    %12 = arith.truncf %9 : vector<8x128xf32> to vector<8x128xbf16>
    %cst_10 = arith.constant dense<0.000000e+00> : vector<8x128xf32>
    %13 = tpu.matmul %12, %10, %cst_10 {dimension_numbers = #tpu.dot_dimension_numbers<[1], [0], [0], [1], [0, 0, 1, 1], [], []>} : vector<8x128xbf16>, vector<128x128xbf16>, vector<8x128xf32> -> vector<8x128xf32>
    %14 = vector.broadcast %11 : vector<1x128xf32> to vector<8x128xf32>
    %15 = arith.addf %13, %14 : vector<8x128xf32>
    %cst_11 = arith.constant 1.000000e-01 : f32
    %16 = vector.broadcast %cst_11 : f32 to vector<8x128xf32>
    %17 = arith.mulf %16, %15 : vector<8x128xf32>
    %18 = arith.maximumf %15, %17 : vector<8x128xf32>
    %c0_12 = arith.constant 0 : index
    %c0_13 = arith.constant 0 : index
    %19 = vector.load %arg6[%c0_12, %c0_13] : memref<128x128xbf16, #tpu.memory_space<vmem>>, vector<128x128xbf16>
    %c0_14 = arith.constant 0 : index
    %c0_15 = arith.constant 0 : index
    %20 = vector.load %arg7[%c0_14, %c0_15] : memref<1x128xf32, #tpu.memory_space<vmem>>, vector<1x128xf32>
    %21 = arith.truncf %18 : vector<8x128xf32> to vector<8x128xbf16>
    %cst_16 = arith.constant dense<0.000000e+00> : vector<8x128xf32>
    %22 = tpu.matmul %21, %19, %cst_16 {dimension_numbers = #tpu.dot_dimension_numbers<[1], [0], [0], [1], [0, 0, 1, 1], [], []>} : vector<8x128xbf16>, vector<128x128xbf16>, vector<8x128xf32> -> vector<8x128xf32>
    %23 = vector.broadcast %20 : vector<1x128xf32> to vector<8x128xf32>
    %24 = arith.addf %22, %23 : vector<8x128xf32>
    %c0_17 = arith.constant 0 : index
    %c0_18 = arith.constant 0 : index
    %25 = vector.load %arg8[%c0_17, %c0_18] : memref<8x128xf32, #tpu.memory_space<vmem>>, vector<8x128xf32>
    tpu.vector_store %arg8[%c0_17, %c0_18], %24 {strides = array<i32>} : memref<8x128xf32, #tpu.memory_space<vmem>>, vector<8x128xf32>,
    return
  }
  func.func @transform_0(%arg0: i32) -> (i32, i32) {
    %c0_i32 = arith.constant 0 : i32
    %c0_i32_0 = arith.constant 0 : i32
    return %arg0, %c0_i32 : i32, i32
  }
  func.func @transform_1(%arg0: i32) -> (i32, i32) {
    %c0_i32 = arith.constant 0 : i32
    %c0_i32_0 = arith.constant 0 : i32
    %c0_i32_1 = arith.constant 0 : i32
    return %c0_i32, %c0_i32_0 : i32, i32
  }
  func.func @transform_2(%arg0: i32) -> (i32, i32) {
    %c0_i32 = arith.constant 0 : i32
    %c0_i32_0 = arith.constant 0 : i32
    %c0_i32_1 = arith.constant 0 : i32
    return %c0_i32, %c0_i32_0 : i32, i32
  }
  func.func @transform_3(%arg0: i32) -> (i32, i32) {
    %c0_i32 = arith.constant 0 : i32
    %c0_i32_0 = arith.constant 0 : i32
    %c0_i32_1 = arith.constant 0 : i32
    return %c0_i32, %c0_i32_0 : i32, i32
  }
  func.func @transform_4(%arg0: i32) -> (i32, i32) {
    %c0_i32 = arith.constant 0 : i32
    %c0_i32_0 = arith.constant 0 : i32
    %c0_i32_1 = arith.constant 0 : i32
    return %c0_i32, %c0_i32_0 : i32, i32
  }
  func.func @transform_5(%arg0: i32) -> (i32, i32) {
    %c0_i32 = arith.constant 0 : i32
    %c0_i32_0 = arith.constant 0 : i32
    %c0_i32_1 = arith.constant 0 : i32
    return %c0_i32, %c0_i32_0 : i32, i32
  }
  func.func @transform_6(%arg0: i32) -> (i32, i32) {
    %c0_i32 = arith.constant 0 : i32
    %c0_i32_0 = arith.constant 0 : i32
    %c0_i32_1 = arith.constant 0 : i32
    return %c0_i32, %c0_i32_0 : i32, i32
  }
  func.func @transform_7(%arg0: i32) -> (i32, i32) {
    %c0_i32 = arith.constant 0 : i32
    %c0_i32_0 = arith.constant 0 : i32
    return %arg0, %c0_i32 : i32, i32
  }
}

module attributes {stable_mosaic.version = 11 : i64} {
  func.func @_mlp_kernel(%arg0: i32, %arg1: memref<8x128xf32, #tpu.memory_space<vmem>>, %arg2: memref<128x128xbf16, #tpu.memory_space<vmem>>, %arg3: memref<1x128xf32, #tpu.memory_space<vmem>>, %arg4: memref<128x128xbf16, #tpu.memory_space<vmem>>, %arg5: memref<1x128xf32, #tpu.memory_space<vmem>>, %arg6: memref<128x128xbf16, #tpu.memory_space<vmem>>, %arg7: memref<1x128xf32, #tpu.memory_space<vmem>>, %arg8: memref<8x128xf32, #tpu.memory_space<vmem>>) attributes {dimension_semantics = [#tpu.dimension_semantics<parallel>], iteration_bounds = array<i64: 1>, scalar_prefetch = 0 : i64, scratch_operands = 0 : i64, tpu.core_type = #tpu.core_type<tc>, window_params = [{transform_indices = @transform_0, window_bounds = array<i64: 8, 128>}, {pipeline_mode = #tpu.pipeline_mode<synchronous>, transform_indices = @transform_1, window_bounds = array<i64: 128, 128>}, {pipeline_mode = #tpu.pipeline_mode<synchronous>, transform_indices = @transform_2, window_bounds = array<i64: 1, 128>}, {pipeline_mode = #tpu.pipeline_mode<synchronous>, transform_indices = @transform_3, window_bounds = array<i64: 128, 128>}, {pipeline_mode = #tpu.pipeline_mode<synchronous>, transform_indices = @transform_4, window_bounds = array<i64: 1, 128>}, {pipeline_mode = #tpu.pipeline_mode<synchronous>, transform_indices = @transform_5, window_bounds = array<i64: 128, 128>}, {pipeline_mode = #tpu.pipeline_mode<synchronous>, transform_indices = @transform_6, window_bounds = array<i64: 1, 128>}, {transform_indices = @transform_7, window_bounds = array<i64: 8, 128>}]} {
    %c0 = arith.constant 0 : index
    %c0_0 = arith.constant 0 : index
    %0 = vector.load %arg1[%c0, %c0_0] : memref<8x128xf32, #tpu.memory_space<vmem>>, vector<8x128xf32>
    %c0_1 = arith.constant 0 : index
    %c0_2 = arith.constant 0 : index
    %1 = vector.load %arg2[%c0_1, %c0_2] : memref<128x128xbf16, #tpu.memory_space<vmem>>, vector<128x128xbf16>
    %c0_3 = arith.constant 0 : index
    %c0_4 = arith.constant 0 : index
    %2 = vector.load %arg3[%c0_3, %c0_4] : memref<1x128xf32, #tpu.memory_space<vmem>>, vector<1x128xf32>
    %3 = arith.truncf %0 : vector<8x128xf32> to vector<8x128xbf16>
    %cst = arith.constant dense<0.000000e+00> : vector<8x128xf32>
    %4 = tpu.matmul %3, %1, %cst {dimension_numbers = #tpu.dot_dimension_numbers<[1], [0], [0], [1], [0, 0, 1, 1], [], []>} : vector<8x128xbf16>, vector<128x128xbf16>, vector<8x128xf32> -> vector<8x128xf32>
    %5 = vector.broadcast %2 : vector<1x128xf32> to vector<8x128xf32>
    %6 = arith.addf %4, %5 : vector<8x128xf32>
    %cst_5 = arith.constant 1.000000e-01 : f32
    %7 = vector.broadcast %cst_5 : f32 to vector<8x128xf32>
    %8 = arith.mulf %7, %6 : vector<8x128xf32>
    %9 = arith.maximumf %6, %8 : vector<8x128xf32>
    %c0_6 = arith.constant 0 : index
    %c0_7 = arith.constant 0 : index
    %10 = vector.load %arg4[%c0_6, %c0_7] : memref<128x128xbf16, #tpu.memory_space<vmem>>, vector<128x128xbf16>
    %c0_8 = arith.constant 0 : index
    %c0_9 = arith.constant 0 : index
    %11 = vector.load %arg5[%c0_8, %c0_9] : memref<1x128xf32, #tpu.memory_space<vmem>>, vector<1x128xf32>
    %12 = arith.truncf %9 : vector<8x128xf32> to vector<8x128xbf16>
    %cst_10 = arith.constant dense<0.000000e+00> : vector<8x128xf32>
    %13 = tpu.matmul %12, %10, %cst_10 {dimension_numbers = #tpu.dot_dimension_numbers<[1], [0], [0], [1], [0, 0, 1, 1], [], []>} : vector<8x128xbf16>, vector<128x128xbf16>, vector<8x128xf32> -> vector<8x128xf32>
    %14 = vector.broadcast %11 : vector<1x128xf32> to vector<8x128xf32>
    %15 = arith.addf %13, %14 : vector<8x128xf32>
    %cst_11 = arith.constant 1.000000e-01 : f32
    %16 = vector.broadcast %cst_11 : f32 to vector<8x128xf32>
    %17 = arith.mulf %16, %15 : vector<8x128xf32>
    %18 = arith.maximumf %15, %17 : vector<8x128xf32>
    %c0_12 = arith.constant 0 : index
    %c0_13 = arith.constant 0 : index
    %19 = vector.load %arg6[%c0_12, %c0_13] : memref<128x128xbf16, #tpu.memory_space<vmem>>, vector<128x128xbf16>
    %c0_14 = arith.constant 0 : index
    %c0_15 = arith.constant 0 : index
    %20 = vector.load %arg7[%c0_14, %c0_15] : memref<1x128xf32, #tpu.memory_space<vmem>>, vector<1x128xf32>
    %21 = arith.truncf %18 : vector<8x128xf32> to vector<8x128xbf16>
    %cst_16 = arith.constant dense<0.000000e+00> : vector<8x128xf32>
    %22 = tpu.matmul %21, %19, %cst_16 {dimension_numbers = #tpu.dot_dimension_numbers<[1], [0], [0], [1], [0, 0, 1, 1], [], []>} : vector<8x128xbf16>, vector<128x128xbf16>, vector<8x128xf32> -> vector<8x128xf32>
    %23 = vector.broadcast %20 : vector<1x128xf32> to vector<8x128xf32>
    %24 = arith.addf %22, %23 : vector<8x128xf32>
    %c0_17 = arith.constant 0 : index
    %c0_18 = arith.constant 0 : index
    %25 = vector.load %arg8[%c0_17, %c0_18] : memref<8x128xf32, #tpu.memory_space<vmem>>, vector<8x128xf32>
    tpu.vector_store %arg8[%c0_17, %c0_18], %24 {strides = array<i32>} : memref<8x128xf32, #tpu.memory_space<vmem>>, vector<8x128xf32>,
    return
  }
  func.func @transform_0(%arg0: i32) -> (i32, i32) {
    %c0_i32 = arith.constant 0 : i32
    %c0_i32_0 = arith.constant 0 : i32
    return %arg0, %c0_i32 : i32, i32
  }
  func.func @transform_1(%arg0: i32) -> (i32, i32) {
    %c0_i32 = arith.constant 0 : i32
    %c0_i32_0 = arith.constant 0 : i32
    %c0_i32_1 = arith.constant 0 : i32
    return %c0_i32, %c0_i32_0 : i32, i32
  }
  func.func @transform_2(%arg0: i32) -> (i32, i32) {
    %c0_i32 = arith.constant 0 : i32
    %c0_i32_0 = arith.constant 0 : i32
    %c0_i32_1 = arith.constant 0 : i32
    return %c0_i32, %c0_i32_0 : i32, i32
  }
  func.func @transform_3(%arg0: i32) -> (i32, i32) {
    %c0_i32 = arith.constant 0 : i32
    %c0_i32_0 = arith.constant 0 : i32
    %c0_i32_1 = arith.constant 0 : i32
    return %c0_i32, %c0_i32_0 : i32, i32
  }
  func.func @transform_4(%arg0: i32) -> (i32, i32) {
    %c0_i32 = arith.constant 0 : i32
    %c0_i32_0 = arith.constant 0 : i32
    %c0_i32_1 = arith.constant 0 : i32
    return %c0_i32, %c0_i32_0 : i32, i32
  }
  func.func @transform_5(%arg0: i32) -> (i32, i32) {
    %c0_i32 = arith.constant 0 : i32
    %c0_i32_0 = arith.constant 0 : i32
    %c0_i32_1 = arith.constant 0 : i32
    return %c0_i32, %c0_i32_0 : i32, i32
  }
  func.func @transform_6(%arg0: i32) -> (i32, i32) {
    %c0_i32 = arith.constant 0 : i32
    %c0_i32_0 = arith.constant 0 : i32
    %c0_i32_1 = arith.constant 0 : i32
    return %c0_i32, %c0_i32_0 : i32, i32
  }
  func.func @transform_7(%arg0: i32) -> (i32, i32) {
    %c0_i32 = arith.constant 0 : i32
    %c0_i32_0 = arith.constant 0 : i32
    return %arg0, %c0_i32 : i32, i32
  }
}

</mosaic_0001>

<bundles_post_ra>
// kernel: tpu_custom_call.1
= control target key start
LH: loop header
LB: loop body
LE: loop exit
PB: predicated region body
PF: predicated region fallthrough
CT: control target
= control target key end

     0   :  { %12 = vsyncpa [#allocation3], 0  ;;  %s688_s0 = inlined_call_operand.hbm [shape: f32[8,128], index: 0, kind: input, shape index: {}]   ;;  %s689_s1 = inlined_call_operand.hbm [shape: bf16[128,128], index: 1, kind: input, shape index: {}]   ;;  %s690_s2 = inlined_call_operand.vmem [shape: f32[1,128], index: 2, kind: input, shape index: {}]   ;;  %s691_s3 = inlined_call_operand.hbm [shape: bf16[128,128], index: 3, kind: input, shape index: {}]   ;;  %s692_s4 = inlined_call_operand.vmem [shape: f32[1,128], index: 4, kind: input, shape index: {}]   ;;  %s693_s5 = inlined_call_operand.hbm [shape: bf16[128,128], index: 5, kind: input, shape index: {}]   ;;  %s694_s6 = inlined_call_operand.vmem [shape: f32[1,128], index: 6, kind: input, shape index: {}]   ;;  %s695_s7 = inlined_call_operand.hbm [shape: f32[8,128], index: 7, kind: output, shape index: {}]  }
   0x1   :  { %13 = vsyncpa [#allocation6], 0 }
   0x2   :  { %14 = vsyncpa [#allocation9], 0  ;;  %s31_s26 = sshll.u32 %s689_s1, 4  ;;  %s32_s26 = int_to_ptr.hbm [resolvable:$true] %s31_s26 }
   0x3   :  { %15 = vsyncpa [#allocation4], 0  ;;  %s617_s27 = smov [#allocation5]   ;;  %s21_s8 = sshll.u32 %s688_s0, 4  ;;  %s22_s8 = int_to_ptr.hbm [resolvable:$true] %s21_s8 }
   0x4   :  { %s33_s28 = sshll.u32 %s617_s27, 4  ;;  %s618_s9 = smov 64   ;;  %s34_s28 = int_to_ptr.vmem [resolvable:$true] %s33_s28 }
   0x5   :  { %s619_s10 = smov 4   ;;  %s620_s11 = smov [#allocation2]  }
   0x6   :  { %39 = dma.hbm_to_vmem [thread:$0]  %s32_s26, 1024, %s34_s28, [#allocation6], %s618_s9, %s618_s9, %s619_s10  }
   0x7   :  { %s23_s12 = sshll.u32 %s620_s11, 4  ;;  %s46_s15 = sshll.u32 %s691_s3, 4  ;;  %s24_s12 = int_to_ptr.vmem [resolvable:$true] %s23_s12  ;;  %s47_s15 = int_to_ptr.hbm [resolvable:$true] %s46_s15 }
   0x8   :  { %26 = dma.hbm_to_vmem [thread:$0]  %s22_s8, 128, %s24_s12, [#allocation3]  }
   0x9   :  { %s61_s17 = sshll.u32 %s693_s5, 4  ;;  %s621_s18 = smov [#allocation7]   ;;  %s62_s17 = int_to_ptr.hbm [resolvable:$true] %s61_s17 }
   0xa   :  { %s48_s19 = sshll.u32 %s621_s18, 4  ;;  %s622_s0 = smov [#allocation8]   ;;  %s49_s19 = int_to_ptr.vmem [resolvable:$true] %s48_s19 }
   0xb   :  { %54 = dma.hbm_to_vmem [thread:$0]  %s47_s15, 1024, %s49_s19, [#allocation6], %s618_s9, %s618_s9, %s619_s10  }
   0xc   :  { %s63_s20 = sshll.u32 %s622_s0, 4  ;;  %s64_s20 = int_to_ptr.vmem [resolvable:$true] %s63_s20 }
   0xd   :  { %69 = dma.hbm_to_vmem [thread:$0]  %s62_s17, 1024, %s64_s20, [#allocation9], %s618_s9, %s618_s9, %s619_s10  }
   0xe   :  { %609 = dma.done.wait [#allocation3], 128  }
   0xf   :  { %610 = vsyncadd [#allocation3], 4294967168 }
  0x10   :  { %611 = dma.done.wait [#allocation6], 2048  }
  0x11   :  { %612 = vsyncadd [#allocation6], 4294965248 }
  0x12   :  { %613 = dma.done.wait [#allocation9], 1024  }
  0x13   :  { %614 = vsyncadd [#allocation9], 4294966272  ;;  %v462_v0 = vld [vmem:[#allocation5 + $0x38] sm:$0xff]  ;;  %v461_v1 = vld [vmem:[#allocation5 + $0x30] sm:$0xff]  ;;  %s623_s24 = smov [#allocation10]   ;;  %s347_s28 = sshll.u32 %s695_s7, 4  ;;  %s348_s28 = int_to_ptr.hbm [resolvable:$true] %s347_s28 }
  0x14   :  { %158 = vmatpush.bf16.msra.mxu0 %v462_v0  ;;  %v470_v2 = vld [vmem:[#allocation7 + $0x38] sm:$0xff]  ;;  %v469_v3 = vld [vmem:[#allocation7 + $0x30] sm:$0xff]  ;;  %v460_v4 = vld [vmem:[#allocation5 + $0x28] sm:$0xff]  ;;  %s345_s25 = sshll.u32 %s623_s24, 4  ;;  %s346_s25 = int_to_ptr.vmem [resolvable:$true] %s345_s25 }
  0x15   :  { %242 = vmatpush.bf16.msra.mxu1 %v470_v2  ;;  %v468_v5 = vld [vmem:[#allocation7 + $0x28] sm:$0xff]  ;;  %v459_v6 = vld [vmem:[#allocation5 + $0x20] sm:$0xff]  ;;  %v458_v8 = vld [vmem:[#allocation5 + $0x18] sm:$0xff] }
  0x16   :  { %v467_v7 = vld [vmem:[#allocation7 + $0x20] sm:$0xff]  ;;  %v466_v9 = vld [vmem:[#allocation7 + $0x18] sm:$0xff]  ;;  %v457_v10 = vld [vmem:[#allocation5 + $0x10] sm:$0xff] }
  0x17   :  { %v465_v11 = vld [vmem:[#allocation7 + $0x10] sm:$0xff]  ;;  %v456_v12 = vld [vmem:[#allocation5 + $0x8] sm:$0xff]  ;;  %v455_v13 = vld [vmem:[#allocation5] sm:$0xff] }
  0x18   :  { %159 = vmatpush.bf16.msra.mxu0 %v461_v1  ;;  %v88_v14 = vld [vmem:[#allocation2] sm:$0xff]  ;;  %v464_v16 = vld [vmem:[#allocation7 + $0x8] sm:$0xff]  ;;  %v463_v17 = vld [vmem:[#allocation7] sm:$0xff] }
  0x19   :  { %243 = vmatpush.bf16.msra.mxu1 %v469_v3  ;;  %v106_v15 = vpack.c.bf16 %v88_v14, %v88_v14  ;;  %v478_v18 = vld [vmem:[#allocation8 + $0x38] sm:$0xff]  ;;  %v477_v19 = vld [vmem:[#allocation8 + $0x30] sm:$0xff]  ;;  %v476_v20 = vld [vmem:[#allocation8 + $0x28] sm:$0xff] }
  0x1a   :  { %326 = vmatpush.bf16.msra.mxu2 %v478_v18  ;;  %v475_v21 = vld [vmem:[#allocation8 + $0x20] sm:$0xff]  ;;  %v474_v22 = vld [vmem:[#allocation8 + $0x18] sm:$0xff]  ;;  %v473_v23 = vld [vmem:[#allocation8 + $0x10] sm:$0xff] }
  0x1b   :  { %v486_v24 = vld [vmem:[%s690_s2] ss:$0 sm:$0xff]  ;;  %v472_v31 = vld [vmem:[#allocation8 + $0x8] sm:$0xff]  ;;  %v471_v32 = vld [vmem:[#allocation8] sm:$0xff] }
  0x1c   :  { %160 = vmatpush.bf16.msra.mxu0 %v460_v4  ;;  %v487_v33 = vld [vmem:[%s692_s4] ss:$0 sm:$0xff] }
  0x1d   :  { %244 = vmatpush.bf16.msra.mxu1 %v468_v5  ;;  %v488_v40 = vld [vmem:[%s694_s6] ss:$0 sm:$0xff] }
  0x1e   :  { %327 = vmatpush.bf16.msra.mxu2 %v477_v19 }
  0x20   :  { %161 = vmatpush.bf16.msra.mxu0 %v459_v6 }
  0x21   :  { %245 = vmatpush.bf16.msra.mxu1 %v467_v7 }
  0x22   :  { %328 = vmatpush.bf16.msra.mxu2 %v476_v20 }
  0x24   :  { %162 = vmatpush.bf16.msra.mxu0 %v458_v8 }
  0x25   :  { %246 = vmatpush.bf16.msra.mxu1 %v466_v9 }
  0x26   :  { %329 = vmatpush.bf16.msra.mxu2 %v475_v21 }
  0x28   :  { %163 = vmatpush.bf16.msra.mxu0 %v457_v10 }
  0x29   :  { %247 = vmatpush.bf16.msra.mxu1 %v465_v11 }
  0x2a   :  { %330 = vmatpush.bf16.msra.mxu2 %v474_v22 }
  0x2c   :  { %164 = vmatpush.bf16.msra.mxu0 %v456_v12 }
  0x2d   :  { %248 = vmatpush.bf16.msra.mxu1 %v464_v16 }
  0x2e   :  { %331 = vmatpush.bf16.msra.mxu2 %v473_v23 }
  0x30   :  { %165 = vmatpush.bf16.msra.mxu0 %v455_v13 }
  0x31   :  { %249 = vmatpush.bf16.msra.mxu1 %v463_v17 }
  0x32   :  { %332 = vmatpush.bf16.msra.mxu2 %v472_v31 }
  0x33   :  { %166 = vmatmul.bf16.vlgmr.msra.gmra.mxu0 %v106_v15 }
  0x36   :  { %333 = vmatpush.bf16.msra.mxu2 %v471_v32 }
  0xb0   :  { %v167_v25 = vpop.f32.mrf.mxu0 }
  0xb1   :  { %v168_v26 = vadd.f32 %v486_v24, %v167_v25 }
  0xb3   :  { %v171_v27 = vmul.f32 0.1, %v168_v26 }
  0xb5   :  { %v172_v28 = vmax.f32 %v168_v26, %v171_v27 }
  0xb7   :  { %v190_v29 = vpack.c.bf16 %v172_v28, %v172_v28 }
  0xb8   :  { %v169_v30 = vpop.f32.mrf.mxu0 }
  0xb9   :  { %250 = vmatmul.bf16.vlgmr.msra.gmra.mxu1 %v190_v29 }
 0x136   :  { %v251_v34 = vpop.f32.mrf.mxu1 }
 0x137   :  { %v252_v35 = vadd.f32 %v487_v33, %v251_v34 }
 0x139   :  { %v255_v36 = vmul.f32 0.1, %v252_v35 }
 0x13b   :  { %v256_v37 = vmax.f32 %v252_v35, %v255_v36 }
 0x13d   :  { %v274_v38 = vpack.c.bf16 %v256_v37, %v256_v37 }
 0x13e   :  { %v253_v39 = vpop.f32.mrf.mxu1 }
 0x13f   :  { %334 = vmatmul.bf16.vlgmr.msra.gmra.mxu2 %v274_v38 }
 0x1c2   :  { %v335_v41 = vpop.f32.mrf.mxu2 }
 0x1c3   :  { %v336_v42 = vadd.f32 %v488_v40, %v335_v41 }
 0x1c5   :  { %339 = vst [vmem:[#allocation10] sm:$0xff] %v336_v42 }
 0x1c6   :  { %350 = dma.vmem_to_hbm [thread:$0]  %s346_s25, 128, %s348_s28, [#allocation4]  }
 0x1ca   :  { %v337_v43 = vpop.f32.mrf.mxu2 }
 0x1cb   :  { %615 = dma.done.wait [#allocation4], 128  }
 0x1cc   :  { %616 = vsyncadd [#allocation4], 4294967168 }
 0x1cd   :  { %355 = vsyncpa [#allocation3], 1 }
 0x1ce   :  { %356 = vsyncpa [#allocation6], 1 }
 0x1cf   :  { %357 = vsyncpa [#allocation9], 1 }
 0x1d0   :  { %358 = vsyncpa [#allocation4], 1 }

// kernel: tpu_custom_call.1
= control target key start
LH: loop header
LB: loop body
LE: loop exit
PB: predicated region body
PF: predicated region fallthrough
CT: control target
= control target key end

     0   :  { %12 = vsyncpa [#allocation3], 0  ;;  %s688_s0 = inlined_call_operand.hbm [shape: f32[8,128], index: 0, kind: input, shape index: {}]   ;;  %s689_s1 = inlined_call_operand.hbm [shape: bf16[128,128], index: 1, kind: input, shape index: {}]   ;;  %s690_s2 = inlined_call_operand.vmem [shape: f32[1,128], index: 2, kind: input, shape index: {}]   ;;  %s691_s3 = inlined_call_operand.hbm [shape: bf16[128,128], index: 3, kind: input, shape index: {}]   ;;  %s692_s4 = inlined_call_operand.vmem [shape: f32[1,128], index: 4, kind: input, shape index: {}]   ;;  %s693_s5 = inlined_call_operand.hbm [shape: bf16[128,128], index: 5, kind: input, shape index: {}]   ;;  %s694_s6 = inlined_call_operand.vmem [shape: f32[1,128], index: 6, kind: input, shape index: {}]   ;;  %s695_s7 = inlined_call_operand.hbm [shape: f32[8,128], index: 7, kind: output, shape index: {}]  }
   0x1   :  { %13 = vsyncpa [#allocation6], 0 }
   0x2   :  { %14 = vsyncpa [#allocation9], 0  ;;  %s31_s26 = sshll.u32 %s689_s1, 4  ;;  %s32_s26 = int_to_ptr.hbm [resolvable:$true] %s31_s26 }
   0x3   :  { %15 = vsyncpa [#allocation4], 0  ;;  %s617_s27 = smov [#allocation5]   ;;  %s21_s8 = sshll.u32 %s688_s0, 4  ;;  %s22_s8 = int_to_ptr.hbm [resolvable:$true] %s21_s8 }
   0x4   :  { %s33_s28 = sshll.u32 %s617_s27, 4  ;;  %s618_s9 = smov 64   ;;  %s34_s28 = int_to_ptr.vmem [resolvable:$true] %s33_s28 }
   0x5   :  { %s619_s10 = smov 4   ;;  %s620_s11 = smov [#allocation2]  }
   0x6   :  { %39 = dma.hbm_to_vmem [thread:$0]  %s32_s26, 1024, %s34_s28, [#allocation6], %s618_s9, %s618_s9, %s619_s10  }
   0x7   :  { %s23_s12 = sshll.u32 %s620_s11, 4  ;;  %s46_s15 = sshll.u32 %s691_s3, 4  ;;  %s24_s12 = int_to_ptr.vmem [resolvable:$true] %s23_s12  ;;  %s47_s15 = int_to_ptr.hbm [resolvable:$true] %s46_s15 }
   0x8   :  { %26 = dma.hbm_to_vmem [thread:$0]  %s22_s8, 128, %s24_s12, [#allocation3]  }
   0x9   :  { %s61_s17 = sshll.u32 %s693_s5, 4  ;;  %s621_s18 = smov [#allocation7]   ;;  %s62_s17 = int_to_ptr.hbm [resolvable:$true] %s61_s17 }
   0xa   :  { %s48_s19 = sshll.u32 %s621_s18, 4  ;;  %s622_s0 = smov [#allocation8]   ;;  %s49_s19 = int_to_ptr.vmem [resolvable:$true] %s48_s19 }
   0xb   :  { %54 = dma.hbm_to_vmem [thread:$0]  %s47_s15, 1024, %s49_s19, [#allocation6], %s618_s9, %s618_s9, %s619_s10  }
   0xc   :  { %s63_s20 = sshll.u32 %s622_s0, 4  ;;  %s64_s20 = int_to_ptr.vmem [resolvable:$true] %s63_s20 }
   0xd   :  { %69 = dma.hbm_to_vmem [thread:$0]  %s62_s17, 1024, %s64_s20, [#allocation9], %s618_s9, %s618_s9, %s619_s10  }
   0xe   :  { %609 = dma.done.wait [#allocation3], 128  }
   0xf   :  { %610 = vsyncadd [#allocation3], 4294967168 }
  0x10   :  { %611 = dma.done.wait [#allocation6], 2048  }
  0x11   :  { %612 = vsyncadd [#allocation6], 4294965248 }
  0x12   :  { %613 = dma.done.wait [#allocation9], 1024  }
  0x13   :  { %614 = vsyncadd [#allocation9], 4294966272  ;;  %v462_v0 = vld [vmem:[#allocation5 + $0x38] sm:$0xff]  ;;  %v461_v1 = vld [vmem:[#allocation5 + $0x30] sm:$0xff]  ;;  %s623_s24 = smov [#allocation10]   ;;  %s347_s28 = sshll.u32 %s695_s7, 4  ;;  %s348_s28 = int_to_ptr.hbm [resolvable:$true] %s347_s28 }
  0x14   :  { %158 = vmatpush.bf16.msra.mxu0 %v462_v0  ;;  %v470_v2 = vld [vmem:[#allocation7 + $0x38] sm:$0xff]  ;;  %v469_v3 = vld [vmem:[#allocation7 + $0x30] sm:$0xff]  ;;  %v460_v4 = vld [vmem:[#allocation5 + $0x28] sm:$0xff]  ;;  %s345_s25 = sshll.u32 %s623_s24, 4  ;;  %s346_s25 = int_to_ptr.vmem [resolvable:$true] %s345_s25 }
  0x15   :  { %242 = vmatpush.bf16.msra.mxu1 %v470_v2  ;;  %v468_v5 = vld [vmem:[#allocation7 + $0x28] sm:$0xff]  ;;  %v459_v6 = vld [vmem:[#allocation5 + $0x20] sm:$0xff]  ;;  %v458_v8 = vld [vmem:[#allocation5 + $0x18] sm:$0xff] }
  0x16   :  { %v467_v7 = vld [vmem:[#allocation7 + $0x20] sm:$0xff]  ;;  %v466_v9 = vld [vmem:[#allocation7 + $0x18] sm:$0xff]  ;;  %v457_v10 = vld [vmem:[#allocation5 + $0x10] sm:$0xff] }
  0x17   :  { %v465_v11 = vld [vmem:[#allocation7 + $0x10] sm:$0xff]  ;;  %v456_v12 = vld [vmem:[#allocation5 + $0x8] sm:$0xff]  ;;  %v455_v13 = vld [vmem:[#allocation5] sm:$0xff] }
  0x18   :  { %159 = vmatpush.bf16.msra.mxu0 %v461_v1  ;;  %v88_v14 = vld [vmem:[#allocation2] sm:$0xff]  ;;  %v464_v16 = vld [vmem:[#allocation7 + $0x8] sm:$0xff]  ;;  %v463_v17 = vld [vmem:[#allocation7] sm:$0xff] }
  0x19   :  { %243 = vmatpush.bf16.msra.mxu1 %v469_v3  ;;  %v106_v15 = vpack.c.bf16 %v88_v14, %v88_v14  ;;  %v478_v18 = vld [vmem:[#allocation8 + $0x38] sm:$0xff]  ;;  %v477_v19 = vld [vmem:[#allocation8 + $0x30] sm:$0xff]  ;;  %v476_v20 = vld [vmem:[#allocation8 + $0x28] sm:$0xff] }
  0x1a   :  { %326 = vmatpush.bf16.msra.mxu2 %v478_v18  ;;  %v475_v21 = vld [vmem:[#allocation8 + $0x20] sm:$0xff]  ;;  %v474_v22 = vld [vmem:[#allocation8 + $0x18] sm:$0xff]  ;;  %v473_v23 = vld [vmem:[#allocation8 + $0x10] sm:$0xff] }
  0x1b   :  { %v486_v24 = vld [vmem:[%s690_s2] ss:$0 sm:$0xff]  ;;  %v472_v31 = vld [vmem:[#allocation8 + $0x8] sm:$0xff]  ;;  %v471_v32 = vld [vmem:[#allocation8] sm:$0xff] }
  0x1c   :  { %160 = vmatpush.bf16.msra.mxu0 %v460_v4  ;;  %v487_v33 = vld [vmem:[%s692_s4] ss:$0 sm:$0xff] }
  0x1d   :  { %244 = vmatpush.bf16.msra.mxu1 %v468_v5  ;;  %v488_v40 = vld [vmem:[%s694_s6] ss:$0 sm:$0xff] }
  0x1e   :  { %327 = vmatpush.bf16.msra.mxu2 %v477_v19 }
  0x20   :  { %161 = vmatpush.bf16.msra.mxu0 %v459_v6 }
  0x21   :  { %245 = vmatpush.bf16.msra.mxu1 %v467_v7 }
  0x22   :  { %328 = vmatpush.bf16.msra.mxu2 %v476_v20 }
  0x24   :  { %162 = vmatpush.bf16.msra.mxu0 %v458_v8 }
  0x25   :  { %246 = vmatpush.bf16.msra.mxu1 %v466_v9 }
  0x26   :  { %329 = vmatpush.bf16.msra.mxu2 %v475_v21 }
  0x28   :  { %163 = vmatpush.bf16.msra.mxu0 %v457_v10 }
  0x29   :  { %247 = vmatpush.bf16.msra.mxu1 %v465_v11 }
  0x2a   :  { %330 = vmatpush.bf16.msra.mxu2 %v474_v22 }
  0x2c   :  { %164 = vmatpush.bf16.msra.mxu0 %v456_v12 }
  0x2d   :  { %248 = vmatpush.bf16.msra.mxu1 %v464_v16 }
  0x2e   :  { %331 = vmatpush.bf16.msra.mxu2 %v473_v23 }
  0x30   :  { %165 = vmatpush.bf16.msra.mxu0 %v455_v13 }
  0x31   :  { %249 = vmatpush.bf16.msra.mxu1 %v463_v17 }
  0x32   :  { %332 = vmatpush.bf16.msra.mxu2 %v472_v31 }
  0x33   :  { %166 = vmatmul.bf16.vlgmr.msra.gmra.mxu0 %v106_v15 }
  0x36   :  { %333 = vmatpush.bf16.msra.mxu2 %v471_v32 }
  0xb0   :  { %v167_v25 = vpop.f32.mrf.mxu0 }
  0xb1   :  { %v168_v26 = vadd.f32 %v486_v24, %v167_v25 }
  0xb3   :  { %v171_v27 = vmul.f32 0.1, %v168_v26 }
  0xb5   :  { %v172_v28 = vmax.f32 %v168_v26, %v171_v27 }
  0xb7   :  { %v190_v29 = vpack.c.bf16 %v172_v28, %v172_v28 }
  0xb8   :  { %v169_v30 = vpop.f32.mrf.mxu0 }
  0xb9   :  { %250 = vmatmul.bf16.vlgmr.msra.gmra.mxu1 %v190_v29 }
 0x136   :  { %v251_v34 = vpop.f32.mrf.mxu1 }
 0x137   :  { %v252_v35 = vadd.f32 %v487_v33, %v251_v34 }
 0x139   :  { %v255_v36 = vmul.f32 0.1, %v252_v35 }
 0x13b   :  { %v256_v37 = vmax.f32 %v252_v35, %v255_v36 }
 0x13d   :  { %v274_v38 = vpack.c.bf16 %v256_v37, %v256_v37 }
 0x13e   :  { %v253_v39 = vpop.f32.mrf.mxu1 }
 0x13f   :  { %334 = vmatmul.bf16.vlgmr.msra.gmra.mxu2 %v274_v38 }
 0x1c2   :  { %v335_v41 = vpop.f32.mrf.mxu2 }
 0x1c3   :  { %v336_v42 = vadd.f32 %v488_v40, %v335_v41 }
 0x1c5   :  { %339 = vst [vmem:[#allocation10] sm:$0xff] %v336_v42 }
 0x1c6   :  { %350 = dma.vmem_to_hbm [thread:$0]  %s346_s25, 128, %s348_s28, [#allocation4]  }
 0x1ca   :  { %v337_v43 = vpop.f32.mrf.mxu2 }
 0x1cb   :  { %615 = dma.done.wait [#allocation4], 128  }
 0x1cc   :  { %616 = vsyncadd [#allocation4], 4294967168 }
 0x1cd   :  { %355 = vsyncpa [#allocation3], 1 }
 0x1ce   :  { %356 = vsyncpa [#allocation6], 1 }
 0x1cf   :  { %357 = vsyncpa [#allocation9], 1 }
 0x1d0   :  { %358 = vsyncpa [#allocation4], 1 }

</bundles_post_ra>
